<compile_context>
chip_gen: v6e
topology: v6e:2x2x1
jax: 0.10.0
libtpu: 0.0.40
codegen_flags: <defaults>
</compile_context>

<pallas_src>
import jax
import jax.numpy as jnp
from jax.experimental import pallas as pl
from jax.experimental.pallas import tpu as pltpu


def _round_up(n, m):
    return ((n + m - 1) // m) * m


def _mlp_logsoftmax_kernel(x_ref, w1_ref, b1_ref, w2_ref, b2_ref,
                           w3d_ref, b3d_ref, o_ref):
    # fc1 + ReLU (bf16 operands, f32 accumulation / elementwise)
    xb = x_ref[...].astype(jnp.bfloat16)
    h1 = jnp.dot(xb, w1_ref[...], preferred_element_type=jnp.float32)
    h1 = jnp.maximum(h1 + b1_ref[...], 0.0)

    # fc2 + ReLU
    h2 = jnp.dot(h1.astype(jnp.bfloat16), w2_ref[...],
                 preferred_element_type=jnp.float32)
    h2 = jnp.maximum(h2 + b2_ref[...], 0.0)

    # fc3 folded into a 2-class difference projection: d = logit_1 - logit_0
    d = jnp.dot(h2.astype(jnp.bfloat16), w3d_ref[...],
                preferred_element_type=jnp.float32) + b3d_ref[...]   # (TB, 1)

    # log_softmax over the 2 classes, elementwise (no cross-lane max/sum):
    #   col 0 -> -softplus(d),  col 1 -> -softplus(-d) = -(softplus(d) - d)
    sp_pos = jnp.maximum(d, 0.0) + jnp.log(1.0 + jnp.exp(-jnp.abs(d)))
    sp_neg = sp_pos - d
    cols = jax.lax.broadcasted_iota(jnp.int32, o_ref.shape, 1)
    o_ref[...] = jnp.where(cols == 0, -sp_pos, -sp_neg).astype(o_ref.dtype)


def ovarian_classifier_forward(x, params, *, block_batch=256):
    """x: (B, input_size) float32; params: dict of transposed f32 weights/biases."""
    w1 = params["w1"].astype(jnp.bfloat16)        # (F, 128)
    b1 = params["b1"].astype(jnp.float32)         # (1, 128)
    w2 = params["w2"].astype(jnp.bfloat16)        # (128, 64)
    b2 = params["b2"].astype(jnp.float32)         # (1, 64)
    w3 = params["w3"]                             # (64, 2)  f32
    b3 = params["b3"]                             # (1, 2)   f32
    # Fold fc3 into a single difference column (exact for 2-class log-softmax).
    w3d = (w3[:, 1:2] - w3[:, 0:1]).astype(jnp.bfloat16)   # (64, 1)
    b3d = (b3[:, 1:2] - b3[:, 0:1]).astype(jnp.float32)    # (1, 1)

    B, F = x.shape
    tb = min(block_batch, _round_up(max(B, 1), 8))   # sublane-aligned batch tile
    Bp = _round_up(B, tb)
    if Bp != B:
        x = jnp.pad(x, ((0, Bp - B), (0, 0)))        # padded rows sliced off below
    grid = (Bp // tb,)

    H1, H2 = w1.shape[1], w2.shape[1]
    flops = 2 * Bp * (F * H1 + H1 * H2 + H2 * 1)
    bytes_accessed = (Bp * F * 4 + Bp * 2 * 4
                      + w1.size * 2 + w2.size * 2 + w3d.size * 2
                      + b1.size * 4 + b2.size * 4 + b3d.size * 4)

    out = pl.pallas_call(
        _mlp_logsoftmax_kernel,
        out_shape=jax.ShapeDtypeStruct((Bp, 2), jnp.float32),
        grid=grid,
        in_specs=[
            pl.BlockSpec((tb, F), lambda i: (i, 0)),        # x: tiled along batch
            pl.BlockSpec(w1.shape, lambda i: (0, 0)),       # weights stay resident
            pl.BlockSpec(b1.shape, lambda i: (0, 0)),
            pl.BlockSpec(w2.shape, lambda i: (0, 0)),
            pl.BlockSpec(b2.shape, lambda i: (0, 0)),
            pl.BlockSpec(w3d.shape, lambda i: (0, 0)),
            pl.BlockSpec(b3d.shape, lambda i: (0, 0)),
        ],
        out_specs=pl.BlockSpec((tb, 2), lambda i: (i, 0)),
        compiler_params=pltpu.CompilerParams(
            dimension_semantics=("parallel",)),
        cost_estimate=pl.CostEstimate(flops=flops,
                                      transcendentals=2 * Bp,
                                      bytes_accessed=bytes_accessed),
    )(x, w1, b1, w2, b2, w3d, b3d)
    return out[:B]


def init_params(input_size, key):
    """Deterministic init; weights stored as (in, out) = PyTorch weight.T."""
    ks = jax.random.split(key, 6)

    def lin(kw, kb, fan_in, fan_out):
        bound = 1.0 / jnp.sqrt(fan_in)
        w = jax.random.uniform(kw, (fan_in, fan_out), jnp.float32, -bound, bound)
        b = jax.random.uniform(kb, (1, fan_out), jnp.float32, -bound, bound)
        return w, b

    w1, b1 = lin(ks[0], ks[1], input_size, 128)
    w2, b2 = lin(ks[2], ks[3], 128, 64)
    w3, b3 = lin(ks[4], ks[5], 64, 2)
    return dict(w1=w1, b1=b1, w2=w2, b2=b2, w3=w3, b3=b3)


def reference_forward(x, p):
    h1 = jnp.maximum(x @ p["w1"] + p["b1"], 0.0)
    h2 = jnp.maximum(h1 @ p["w2"] + p["b2"], 0.0)
    logits = h2 @ p["w3"] + p["b3"]
    return jax.nn.log_softmax(logits, axis=1)


if __name__ == "__main__":
    input_size = 32
    key = jax.random.PRNGKey(0)
    kx, kp, kx2 = jax.random.split(key, 3)
    params = init_params(input_size, kp)

    # Small batch: single 8-row tile.
    x_small = jax.random.normal(kx, (8, input_size), jnp.float32)
    out_small = jax.block_until_ready(ovarian_classifier_forward(x_small, params))
    ref_small = reference_forward(x_small, params)
    assert out_small.shape == (8, 2)
    assert jnp.allclose(out_small, ref_small, atol=5e-2, rtol=5e-2), (
        float(jnp.max(jnp.abs(out_small - ref_small))))

    # Larger, non-divisible batch: exercises the grid + padding path.
    x_big = jax.random.normal(kx2, (300, input_size), jnp.float32)
    out_big = jax.block_until_ready(ovarian_classifier_forward(x_big, params))
    ref_big = reference_forward(x_big, params)
    assert out_big.shape == (300, 2)
    assert jnp.allclose(out_big, ref_big, atol=5e-2, rtol=5e-2), (
        float(jnp.max(jnp.abs(out_big - ref_big))))

    print("KERNEL_OK")
</pallas_src>

<mosaic_0001>
module attributes {stable_mosaic.version = 11 : i64} {
  func.func @_mlp_logsoftmax_kernel(%arg0: i32, %arg1: memref<8x32xf32, #tpu.memory_space<vmem>>, %arg2: memref<32x128xbf16, #tpu.memory_space<vmem>>, %arg3: memref<1x128xf32, #tpu.memory_space<vmem>>, %arg4: memref<128x64xbf16, #tpu.memory_space<vmem>>, %arg5: memref<1x64xf32, #tpu.memory_space<vmem>>, %arg6: memref<64x1xbf16, #tpu.memory_space<vmem>>, %arg7: memref<1x1xf32, #tpu.memory_space<vmem>>, %arg8: memref<8x2xf32, #tpu.memory_space<vmem>>) attributes {dimension_semantics = [#tpu.dimension_semantics<parallel>], iteration_bounds = array<i64: 1>, scalar_prefetch = 0 : i64, scratch_operands = 0 : i64, tpu.core_type = #tpu.core_type<tc>, window_params = [{transform_indices = @transform_0, window_bounds = array<i64: 8, 32>}, {pipeline_mode = #tpu.pipeline_mode<synchronous>, transform_indices = @transform_1, window_bounds = array<i64: 32, 128>}, {pipeline_mode = #tpu.pipeline_mode<synchronous>, transform_indices = @transform_2, window_bounds = array<i64: 1, 128>}, {pipeline_mode = #tpu.pipeline_mode<synchronous>, transform_indices = @transform_3, window_bounds = array<i64: 128, 64>}, {pipeline_mode = #tpu.pipeline_mode<synchronous>, transform_indices = @transform_4, window_bounds = array<i64: 1, 64>}, {pipeline_mode = #tpu.pipeline_mode<synchronous>, transform_indices = @transform_5, window_bounds = array<i64: 64, 1>}, {pipeline_mode = #tpu.pipeline_mode<synchronous>, transform_indices = @transform_6, window_bounds = array<i64: 1, 1>}, {transform_indices = @transform_7, window_bounds = array<i64: 8, 2>}]} {
    %c0 = arith.constant 0 : index
    %c0_0 = arith.constant 0 : index
    %0 = vector.load %arg1[%c0, %c0_0] : memref<8x32xf32, #tpu.memory_space<vmem>>, vector<8x32xf32>
    %1 = arith.truncf %0 : vector<8x32xf32> to vector<8x32xbf16>
    %c0_1 = arith.constant 0 : index
    %c0_2 = arith.constant 0 : index
    %2 = vector.load %arg2[%c0_1, %c0_2] : memref<32x128xbf16, #tpu.memory_space<vmem>>, vector<32x128xbf16>
    %cst = arith.constant dense<0.000000e+00> : vector<8x128xf32>
    %3 = tpu.matmul %1, %2, %cst {dimension_numbers = #tpu.dot_dimension_numbers<[1], [0], [0], [1], [0, 0, 1, 1], [], []>} : vector<8x32xbf16>, vector<32x128xbf16>, vector<8x128xf32> -> vector<8x128xf32>
    %c0_3 = arith.constant 0 : index
    %c0_4 = arith.constant 0 : index
    %4 = vector.load %arg3[%c0_3, %c0_4] : memref<1x128xf32, #tpu.memory_space<vmem>>, vector<1x128xf32>
    %5 = vector.broadcast %4 : vector<1x128xf32> to vector<8x128xf32>
    %6 = arith.addf %3, %5 : vector<8x128xf32>
    %cst_5 = arith.constant 0.000000e+00 : f32
    %7 = vector.broadcast %cst_5 : f32 to vector<8x128xf32>
    %8 = arith.maximumf %6, %7 : vector<8x128xf32>
    %9 = arith.truncf %8 : vector<8x128xf32> to vector<8x128xbf16>
    %c0_6 = arith.constant 0 : index
    %c0_7 = arith.constant 0 : index
    %10 = vector.load %arg4[%c0_6, %c0_7] : memref<128x64xbf16, #tpu.memory_space<vmem>>, vector<128x64xbf16>
    %cst_8 = arith.constant dense<0.000000e+00> : vector<8x64xf32>
    %11 = tpu.matmul %9, %10, %cst_8 {dimension_numbers = #tpu.dot_dimension_numbers<[1], [0], [0], [1], [0, 0, 1, 1], [], []>} : vector<8x128xbf16>, vector<128x64xbf16>, vector<8x64xf32> -> vector<8x64xf32>
    %c0_9 = arith.constant 0 : index
    %c0_10 = arith.constant 0 : index
    %12 = vector.load %arg5[%c0_9, %c0_10] : memref<1x64xf32, #tpu.memory_space<vmem>>, vector<1x64xf32>
    %13 = vector.broadcast %12 : vector<1x64xf32> to vector<8x64xf32>
    %14 = arith.addf %11, %13 : vector<8x64xf32>
    %cst_11 = arith.constant 0.000000e+00 : f32
    %15 = vector.broadcast %cst_11 : f32 to vector<8x64xf32>
    %16 = arith.maximumf %14, %15 : vector<8x64xf32>
    %17 = arith.truncf %16 : vector<8x64xf32> to vector<8x64xbf16>
    %c0_12 = arith.constant 0 : index
    %c0_13 = arith.constant 0 : index
    %18 = vector.load %arg6[%c0_12, %c0_13] : memref<64x1xbf16, #tpu.memory_space<vmem>>, vector<64x1xbf16>
    %cst_14 = arith.constant dense<0.000000e+00> : vector<8x1xf32>
    %19 = tpu.matmul %17, %18, %cst_14 {dimension_numbers = #tpu.dot_dimension_numbers<[1], [0], [0], [1], [0, 0, 1, 1], [], []>} : vector<8x64xbf16>, vector<64x1xbf16>, vector<8x1xf32> -> vector<8x1xf32>
    %c0_15 = arith.constant 0 : index
    %c0_16 = arith.constant 0 : index
    %20 = vector.load %arg7[%c0_15, %c0_16] : memref<1x1xf32, #tpu.memory_space<vmem>>, vector<1x1xf32>
    %21 = vector.broadcast %20 : vector<1x1xf32> to vector<8x1xf32>
    %22 = arith.addf %19, %21 : vector<8x1xf32>
    %cst_17 = arith.constant 0.000000e+00 : f32
    %23 = vector.broadcast %cst_17 : f32 to vector<8x1xf32>
    %24 = arith.maximumf %22, %23 : vector<8x1xf32>
    %25 = math.absf %22 : vector<8x1xf32>
    %cst_18 = arith.constant 0.000000e+00 : f32
    %26 = vector.broadcast %cst_18 : f32 to vector<8x1xf32>
    %27 = arith.subf %26, %25 : vector<8x1xf32>
    %28 = math.exp %27 : vector<8x1xf32>
    %cst_19 = arith.constant 1.000000e+00 : f32
    %29 = vector.broadcast %cst_19 : f32 to vector<8x1xf32>
    %30 = arith.addf %29, %28 : vector<8x1xf32>
    %31 = math.log %30 : vector<8x1xf32>
    %32 = arith.addf %24, %31 : vector<8x1xf32>
    %33 = arith.subf %32, %22 : vector<8x1xf32>
    %34 = tpu.iota {dimensions = array<i32: 1>} : vector<8x2xi32>
    %c0_i32 = arith.constant 0 : i32
    %35 = vector.broadcast %c0_i32 : i32 to vector<8x2xi32>
    %36 = arith.cmpi eq, %34, %35 : vector<8x2xi32>
    %cst_20 = arith.constant 0.000000e+00 : f32
    %37 = vector.broadcast %cst_20 : f32 to vector<8x1xf32>
    %38 = arith.subf %37, %32 : vector<8x1xf32>
    %cst_21 = arith.constant 0.000000e+00 : f32
    %39 = vector.broadcast %cst_21 : f32 to vector<8x1xf32>
    %40 = arith.subf %39, %33 : vector<8x1xf32>
    %41 = vector.shape_cast %38 : vector<8x1xf32> to vector<8x1xf32>
    %42 = vector.broadcast %41 : vector<8x1xf32> to vector<8x2xf32>
    %43 = vector.shape_cast %40 : vector<8x1xf32> to vector<8x1xf32>
    %44 = vector.broadcast %43 : vector<8x1xf32> to vector<8x2xf32>
    %45 = arith.select %36, %42, %44 : vector<8x2xi1>, vector<8x2xf32>
    %c0_22 = arith.constant 0 : index
    %c0_23 = arith.constant 0 : index
    %46 = vector.load %arg8[%c0_22, %c0_23] : memref<8x2xf32, #tpu.memory_space<vmem>>, vector<8x2xf32>
    tpu.vector_store %arg8[%c0_22, %c0_23], %45 {strides = array<i32>} : memref<8x2xf32, #tpu.memory_space<vmem>>, vector<8x2xf32>,
    return
  }
  func.func @transform_0(%arg0: i32) -> (i32, i32) {
    %c0_i32 = arith.constant 0 : i32
    %c0_i32_0 = arith.constant 0 : i32
    return %arg0, %c0_i32 : i32, i32
  }
  func.func @transform_1(%arg0: i32) -> (i32, i32) {
    %c0_i32 = arith.constant 0 : i32
    %c0_i32_0 = arith.constant 0 : i32
    %c0_i32_1 = arith.constant 0 : i32
    return %c0_i32, %c0_i32_0 : i32, i32
  }
  func.func @transform_2(%arg0: i32) -> (i32, i32) {
    %c0_i32 = arith.constant 0 : i32
    %c0_i32_0 = arith.constant 0 : i32
    %c0_i32_1 = arith.constant 0 : i32
    return %c0_i32, %c0_i32_0 : i32, i32
  }
  func.func @transform_3(%arg0: i32) -> (i32, i32) {
    %c0_i32 = arith.constant 0 : i32
    %c0_i32_0 = arith.constant 0 : i32
    %c0_i32_1 = arith.constant 0 : i32
    return %c0_i32, %c0_i32_0 : i32, i32
  }
  func.func @transform_4(%arg0: i32) -> (i32, i32) {
    %c0_i32 = arith.constant 0 : i32
    %c0_i32_0 = arith.constant 0 : i32
    %c0_i32_1 = arith.constant 0 : i32
    return %c0_i32, %c0_i32_0 : i32, i32
  }
  func.func @transform_5(%arg0: i32) -> (i32, i32) {
    %c0_i32 = arith.constant 0 : i32
    %c0_i32_0 = arith.constant 0 : i32
    %c0_i32_1 = arith.constant 0 : i32
    return %c0_i32, %c0_i32_0 : i32, i32
  }
  func.func @transform_6(%arg0: i32) -> (i32, i32) {
    %c0_i32 = arith.constant 0 : i32
    %c0_i32_0 = arith.constant 0 : i32
    %c0_i32_1 = arith.constant 0 : i32
    return %c0_i32, %c0_i32_0 : i32, i32
  }
  func.func @transform_7(%arg0: i32) -> (i32, i32) {
    %c0_i32 = arith.constant 0 : i32
    %c0_i32_0 = arith.constant 0 : i32
    return %arg0, %c0_i32 : i32, i32
  }
}

</mosaic_0001>

<bundles_post_ra>
// kernel: tpu_custom_call.1
= control target key start
LH: loop header
LB: loop body
LE: loop exit
PB: predicated region body
PF: predicated region fallthrough
CT: control target
= control target key end

     0   :  { %v426_v0 = vmov 0.0   ;;  %vm427_vm0 = vmmov 0   ;;  %vm54_vm1 = vcmask 261120   ;;  %vm252_vm2 = vcmask 523264   ;;  %s529_s1 = inlined_call_operand.vmem [shape: bf16[32,128], index: 1, kind: input, shape index: {}]   ;;  %s530_s0 = inlined_call_operand.vmem [shape: f32[8,32], index: 0, kind: input, shape index: {}]   ;;  %s531_s3 = inlined_call_operand.vmem [shape: bf16[128,64], index: 3, kind: input, shape index: {}]   ;;  %s532_s5 = inlined_call_operand.vmem [shape: bf16[64,1], index: 5, kind: input, shape index: {}]   ;;  %s533_s2 = inlined_call_operand.vmem [shape: f32[1,128], index: 2, kind: input, shape index: {}]   ;;  %s534_s6 = inlined_call_operand.<no memory space> [shape: f32[1,1], index: 6, kind: input, shape index: {}]   ;;  %s535_s4 = inlined_call_operand.vmem [shape: f32[1,64], index: 4, kind: input, shape index: {}]   ;;  %s536_s7 = inlined_call_operand.vmem [shape: f32[8,2], index: 7, kind: output, shape index: {}]  }
   0x1   :  { %364 = vmatprep.subr.bf16.mxu0 %v426_v0  ;;  %v408_v1 = vld [vmem:[%s529_s1 + $0x8] sm:$0xff]   ;;  %368 = vmatprep.mubr.msk.bf16.mxu0 %vm427_vm0, %v426_v0  ;;  %v409_v2 = vld [vmem:[%s529_s1] sm:$0xff]   ;;  %v410_v4 = vld [vmem:[%s531_s3 + $0x38] sm:$0xff]   ;;  %v12_v25 = vstv %s534_s6  ;;  %v428_v34 = vmov 0   ;;  %v306_v53 = vlaneseq  ;;  %vm322_vm4 = vcmask 15360  }
   0x2   :  { %372 = vmatprep.subr.bf16.mxu1 %v426_v0  ;;  %388 = vmatprep.mubr.msk.bf16.mxu1 %vm427_vm0, %v426_v0  ;;  %v29_v3 = vld [vmem:[%s530_s0] sm:$0xff]  ;;  %v411_v6 = vld [vmem:[%s531_s3 + $0x30] sm:$0xff]   ;;  %v412_v7 = vld [vmem:[%s531_s3 + $0x28] sm:$0xff]   ;;  %13 = vst [vmem:[#allocation2] sm:$0x1] %v12_v25 }
   0x3   :  { %365 = vmatpush3.bf16.msra.mxu0 %v408_v1  ;;  %v30_v5 = vpack.c.bf16 %v29_v3, %v29_v3  ;;  %373 = vmatpush3.bf16.msra.mxu1 %v410_v4  ;;  %v413_v8 = vld [vmem:[%s531_s3 + $0x20] sm:$0xff]   ;;  %v414_v9 = vld [vmem:[%s531_s3 + $0x18] sm:$0xff]   ;;  %v415_v10 = vld [vmem:[%s531_s3 + $0x10] sm:$0xff]   ;;  %v307_v54 = vand.u32 127, %v306_v53 }
   0x4   :  { %366 = vmatprep.subr.bf16.mxu0 %v426_v0  ;;  %374 = vmatprep.subr.bf16.mxu1 %v426_v0  ;;  %v416_v11 = vld [vmem:[%s531_s3 + $0x8] sm:$0xff]   ;;  %v417_v12 = vld [vmem:[%s531_s3] sm:$0xff]   ;;  %v418_v13 = vld [vmem:[%s532_s5 + $0x18] sm:$0xff]  }
   0x5   :  { %v419_v14 = vld [vmem:[%s532_s5 + $0x10] sm:$0xff]   ;;  %v328_v15 = vld [vmem:[%s533_s2] ss:$0 sm:$0xff]  ;;  %v420_v23 = vld [vmem:[%s532_s5 + $0x8] sm:$0xff]   ;;  %407 = vset.pattern.permute.xlu0 %v428_v34  ;;  %vm308_vm3 = vcmp.eq.s32.totalorder %v307_v54, 0 }
   0x6   :  { %v421_v24 = vld [vmem:[%s532_s5] sm:$0xff]  }
   0x7   :  { %367 = vmatpush3.bf16.msra.mxu0 %v409_v2  ;;  %375 = vmatpush3.bf16.msra.mxu1 %v411_v6  ;;  %v332_v26 = vld [vmem:[%s535_s4] ss:$0 sm:$0xff] }
   0x8   :  { %392 = vmatprep.subr.bf16.mxu0 %v426_v0  ;;  %376 = vmatprep.subr.bf16.mxu1 %v426_v0 }
   0x9   :  { %v341_v35 = vld [vmem:[#allocation2] ss:$0 sm:$0xff] }
   0xa   :  { %369 = vmatmul.mubr.msk.bf16.vlgmr.msra.gmra.mxu0 %vm54_vm1, %v30_v5 }
   0xb   :  { %400 = vmatprep.mubr.msk.bf16.mxu0 %vm427_vm0, %v426_v0  ;;  %377 = vmatpush3.bf16.msra.mxu1 %v412_v7 }
   0xc   :  { %378 = vmatprep.subr.bf16.mxu1 %v426_v0  ;;  %393 = vmatpush3.bf16.msra.mxu0 %v418_v13 }
   0xd   :  { %394 = vmatprep.subr.bf16.mxu0 %v426_v0 }
   0xf   :  { %379 = vmatpush3.bf16.msra.mxu1 %v413_v8 }
  0x10   :  { %380 = vmatprep.subr.bf16.mxu1 %v426_v0  ;;  %395 = vmatpush3.bf16.msra.mxu0 %v419_v14 }
  0x11   :  { %396 = vmatprep.subr.bf16.mxu0 %v426_v0 }
  0x13   :  { %381 = vmatpush3.bf16.msra.mxu1 %v414_v9 }
  0x14   :  { %382 = vmatprep.subr.bf16.mxu1 %v426_v0  ;;  %397 = vmatpush3.bf16.msra.mxu0 %v420_v23 }
  0x15   :  { %398 = vmatprep.subr.bf16.mxu0 %v426_v0 }
  0x17   :  { %383 = vmatpush3.bf16.msra.mxu1 %v415_v10 }
  0x18   :  { %384 = vmatprep.subr.bf16.mxu1 %v426_v0  ;;  %399 = vmatpush3.bf16.msra.mxu0 %v421_v24 }
  0x1b   :  { %385 = vmatpush3.bf16.msra.mxu1 %v416_v11 }
  0x1c   :  { %386 = vmatprep.subr.bf16.mxu1 %v426_v0 }
  0x1f   :  { %387 = vmatpush3.bf16.msra.mxu1 %v417_v12 }
  0xca   :  { %v92_v16 = vpop.f32.mrf.mxu0 }
  0xcb   :  { %v93_v17 = vadd.f32 %v328_v15, %v92_v16 }
  0xcc   :  { %v370_v18 = vpop.f32.mrf.mxu0 }
  0xcd   :  { %v98_v19 = vmax.f32 %v93_v17, 0.0 }
  0xce   :  { %v95_v20 = vpop.f32.mrf.mxu0 }
  0xcf   :  { %v99_v21 = vpack.c.bf16 %v98_v19, %v98_v19 }
  0xd0   :  { %v371_v22 = vpop.f32.mrf.mxu0 }
  0xd1   :  { %389 = vmatmul.mubr.bf16.vlgmr.msra.gmra.mxu1 %v99_v21 }
 0x191   :  { %v205_v27 = vpop.f32.mrf.mxu1 }
 0x192   :  { %v206_v28 = vadd.f32 %v332_v26, %v205_v27 }
 0x193   :  { %v390_v29 = vpop.f32.mrf.mxu1 }
 0x194   :  { %v211_v30 = vmax.f32 %v206_v28, 0.0 }
 0x195   :  { %v208_v31 = vpop.f32.mrf.mxu1 }
 0x196   :  { %v212_v32 = vpack.c.bf16 %v211_v30, %v211_v30 }
 0x197   :  { %v391_v33 = vpop.f32.mrf.mxu1 }
 0x198   :  { %401 = vmatmul.mubr.msk.bf16.vlgmr.msra.gmra.mxu0 %vm252_vm2, %v212_v32 }
 0x258   :  { %v290_v36 = vpop.f32.mrf.mxu0 }
 0x259   :  { %v291_v37 = vadd.f32 %v341_v35, %v290_v36 }
 0x25a   :  { %v402_v38 = vpop.f32.mrf.mxu0 }
 0x25b   :  { %v297_v39 = vand.u32 2147483647, %v291_v37  ;;  %v296_v47 = vmax.f32 %v291_v37, 0.0 }
 0x25c   :  { %v293_v40 = vpop.f32.mrf.mxu0 }
 0x25d   :  { %v298_v41 = vsub.f32 0.0, %v297_v39 }
 0x25e   :  { %v403_v42 = vpop.f32.mrf.mxu0 }
 0x25f   :  { %v299_v43 = vmul.f32 1.442695, %v298_v41 }
 0x261   :  { %422 = vpow2.f32 %v299_v43 }
 0x26e   :  { %v423_v44 = vpop.eup %422 }
 0x26f   :  { %v301_v45 = vadd.f32 1.0, %v423_v44 }
 0x271   :  { %424 = vlog2.f32 %v301_v45 }
 0x27e   :  { %v425_v46 = vpop.eup %424 }
 0x27f   :  { %v303_v48 = vmul.f32 0.6931472, %v425_v46 }
 0x281   :  { %v304_v49 = vadd.f32 %v303_v48, %v296_v47 }
 0x283   :  { %v309_v50 = vsub.f32 0.0, %v304_v49  ;;  %v305_v51 = vsub.f32 %v304_v49, %v291_v37 }
 0x285   :  { %313 = vperm.xlu0 %407, %v309_v50   ;;  %v310_v52 = vsub.f32 0.0, %v305_v51 }
 0x289   :  { %318 = vperm.xlu0 %407, %v310_v52  }
 0x300   :  { %v314_v55 = vpop.permute.xlu0 %313 }
 0x304   :  { %v319_v56 = vpop.permute.xlu0 %318 }
 0x305   :  { %v321_v57 = vsel %vm308_vm3, %v314_v55, %v319_v56 }
 0x306   :  { %323 = vst.msk [vmem:[%s536_s7] sm:$0xff] %vm322_vm4, %v321_v57 }

</bundles_post_ra>
